<compile_context>
chip_gen: v6e
topology: v6e:2x2x1
jax: 0.10.0
libtpu: 0.0.40
codegen_flags: <defaults>
</compile_context>

<pallas_src>
import functools

import jax
import jax.numpy as jnp
from jax import lax
from jax.experimental import pallas as pl
from jax.experimental.pallas import tpu as pltpu

EPS = 1e-5  # nn.LayerNorm default


def _round_up(a: int, b: int) -> int:
    return ((a + b - 1) // b) * b


# --------------------------------------------------------------------------
# Kernels
# --------------------------------------------------------------------------
def _prenorm_linear_kernel(x_ref, g_ref, b_ref, w_ref, wb_ref, o_ref, *,
                           mm_dtype):
    """Resident-W path: LayerNorm over last dim, then y = xn @ W + b."""
    x = x_ref[...].astype(jnp.float32)                  # (tm, D)
    inv_d = jnp.float32(1.0 / x.shape[-1])
    mean = jnp.sum(x, axis=-1, keepdims=True) * inv_d
    xc = x - mean
    var = jnp.sum(xc * xc, axis=-1, keepdims=True) * inv_d
    xn = xc * lax.rsqrt(var + EPS)
    xn = xn * g_ref[...] + b_ref[...]
    y = jnp.dot(xn.astype(mm_dtype), w_ref[...],
                preferred_element_type=jnp.float32)
    o_ref[...] = (y + wb_ref[...]).astype(o_ref.dtype)


def _prenorm_linear_stream_kernel(x_ref, g_ref, b_ref, w_ref, wb_ref, o_ref,
                                  xn_ref, *, mm_dtype):
    """Streamed-W path: LN once per row tile (col==0), matmul per column block."""
    @pl.when(pl.program_id(1) == 0)
    def _():
        x = x_ref[...].astype(jnp.float32)              # (tm, D)
        inv_d = jnp.float32(1.0 / x.shape[-1])
        mean = jnp.sum(x, axis=-1, keepdims=True) * inv_d
        xc = x - mean
        var = jnp.sum(xc * xc, axis=-1, keepdims=True) * inv_d
        xn = xc * lax.rsqrt(var + EPS)
        xn_ref[...] = (xn * g_ref[...] + b_ref[...]).astype(mm_dtype)

    y = jnp.dot(xn_ref[...], w_ref[...], preferred_element_type=jnp.float32)
    o_ref[...] = (y + wb_ref[...]).astype(o_ref.dtype)


# --------------------------------------------------------------------------
# Wrapper
# --------------------------------------------------------------------------
def prenorm_linear(x, ln_gamma, ln_beta, w, wb, *,
                   row_tile=None, col_tile=512,
                   use_bf16_matmul=True, out_dtype=None,
                   vmem_budget_bytes=None, force_stream_w=False):
    """x: (B, N, D). Returns fn(LayerNorm(x)) with fn = Linear(D, D).

    w is stored as (in, out) = W_pytorch.T; wb is the Linear bias (D,).
    """
    B, N, D = x.shape
    M = B * N

    out_dtype = jnp.dtype(out_dtype) if out_dtype is not None else x.dtype
    mm_dtype = jnp.bfloat16 if use_bf16_matmul else jnp.float32
    w_el = 2 if use_bf16_matmul else 4
    el_x = x.dtype.itemsize
    el_o = jnp.dtype(out_dtype).itemsize
    mm_el = jnp.dtype(mm_dtype).itemsize

    # ---- generation-aware VMEM budget (v5e/v6e: 128 MiB, v7x: 64 MiB/TC) ----
    try:
        cap = int(getattr(pltpu.get_tpu_info(), "vmem_capacity_bytes", 0)) \
            or (64 << 20)
    except Exception:
        cap = 64 << 20
    if vmem_budget_bytes is None:
        vmem_budget_bytes = min((cap * 3) // 4, 100 << 20)

    # ---- resident-W vs streamed-W (column-tiled) decision ----
    params_bytes = 2 * 3 * D * 4                       # gamma/beta/bias (f32)
    resident_w_bytes = 2 * D * D * w_el                # conservative: 2 buffers
    min_moving = 2 * 256 * D * (el_x + el_o)
    can_stream = (D % 128 == 0)

    stream_w = bool(force_stream_w and can_stream)
    if (not stream_w and can_stream
            and resident_w_bytes + params_bytes + min_moving > vmem_budget_bytes):
        stream_w = True

    tn = D
    if stream_w:
        col_tile = max(int(col_tile), 128)
        cands = [t for t in (1024, 512, 256, 128)
                 if t <= D and D % t == 0 and t <= col_tile]
        tn = cands[0] if cands else 128

    # ---- row tile: large for narrow D, budgeted against MOVING tiles only ----
    if row_tile is None:
        row_tile = 4096 if D <= 256 else (2048 if D <= 512 else 512)
    tm = max(8, min(_round_up(int(row_tile), 8), _round_up(M, 8)))
    if M >= 1024:  # keep >= 2 row-grid steps for megacore sharding
        tm = min(tm, _round_up((M + 1) // 2, 8))

    def moving_bytes(t):
        mb = 2 * t * D * el_x + 2 * t * (tn if stream_w else D) * el_o
        if stream_w:
            mb += t * D * mm_el                        # xn VMEM scratch
        return mb

    if stream_w:
        res_bytes = 2 * (D * tn * w_el + tn * 4) + params_bytes
    else:
        res_bytes = resident_w_bytes + params_bytes
    avail = max(vmem_budget_bytes - res_bytes, 2 << 20)
    while tm > 256 and moving_bytes(tm) > avail:
        tm = max(256, _round_up(tm // 2, 8))
    tm = max(8, min(tm, _round_up(M, 8)))

    Mp = _round_up(M, tm)
    est = moving_bytes(tm) + res_bytes
    vmem_limit = int(min(min(cap, 128 << 20), max(32 << 20, 2 * est)))

    # ---- operands (no D padding anywhere; rows padded only if needed) ----
    x2 = x.reshape(M, D)
    if Mp > M:
        x2 = jnp.pad(x2, ((0, Mp - M), (0, 0)))
    g2 = ln_gamma.reshape(1, D).astype(jnp.float32)
    b2 = ln_beta.reshape(1, D).astype(jnp.float32)
    wb2 = wb.reshape(1, D).astype(jnp.float32)
    w2 = w.astype(mm_dtype)

    cost = pl.CostEstimate(
        flops=int(2 * Mp * D * D + 8 * Mp * D),
        transcendentals=int(Mp),
        bytes_accessed=int(Mp * D * el_x + Mp * D * el_o + D * D * w_el
                           + 4 * D * 4),
    )

    def build(single_buffer_residents: bool):
        const = (dict(pipeline_mode=pl.Buffered(1))
                 if single_buffer_residents else {})
        if stream_w:
            kernel = functools.partial(_prenorm_linear_stream_kernel,
                                       mm_dtype=mm_dtype)
            grid = (Mp // tm, D // tn)
            in_specs = [
                pl.BlockSpec((tm, D), lambda i, j: (i, 0)),            # x
                pl.BlockSpec((1, D), lambda i, j: (0, 0), **const),    # gamma
                pl.BlockSpec((1, D), lambda i, j: (0, 0), **const),    # beta
                pl.BlockSpec((D, tn), lambda i, j: (0, j)),            # W cols
                pl.BlockSpec((1, tn), lambda i, j: (0, j)),            # bias
            ]
            out_specs = pl.BlockSpec((tm, tn), lambda i, j: (i, j))
            scratch = [pltpu.VMEM((tm, D), mm_dtype)]
            semantics = ("parallel", "arbitrary")
        else:
            kernel = functools.partial(_prenorm_linear_kernel,
                                       mm_dtype=mm_dtype)
            grid = (Mp // tm,)
            in_specs = [
                pl.BlockSpec((tm, D), lambda i: (i, 0)),               # x
                pl.BlockSpec((1, D), lambda i: (0, 0), **const),       # gamma
                pl.BlockSpec((1, D), lambda i: (0, 0), **const),       # beta
                pl.BlockSpec((D, D), lambda i: (0, 0), **const),       # W
                pl.BlockSpec((1, D), lambda i: (0, 0), **const),       # bias
            ]
            out_specs = pl.BlockSpec((tm, D), lambda i: (i, 0))
            scratch = []
            semantics = ("parallel",)

        return pl.pallas_call(
            kernel,
            out_shape=jax.ShapeDtypeStruct((Mp, D), out_dtype),
            grid_spec=pltpu.PrefetchScalarGridSpec(
                num_scalar_prefetch=0,
                grid=grid,
                in_specs=in_specs,
                out_specs=out_specs,
                scratch_shapes=scratch),
            compiler_params=pltpu.CompilerParams(
                dimension_semantics=semantics,
                vmem_limit_bytes=vmem_limit),
            cost_estimate=cost,
        )

    try:
        out = build(True)(x2, g2, b2, w2, wb2)
    except Exception:
        # pl.Buffered(1) not accepted by this JAX version -> default buffering.
        out = build(False)(x2, g2, b2, w2, wb2)

    if Mp > M:
        out = out[:M]
    return out.reshape(B, N, D)


# --------------------------------------------------------------------------
# Reference + self-test
# --------------------------------------------------------------------------
def _reference(x, ln_gamma, ln_beta, w, wb):
    mean = jnp.mean(x, axis=-1, keepdims=True)
    var = jnp.mean((x - mean) ** 2, axis=-1, keepdims=True)
    xn = (x - mean) / jnp.sqrt(var + EPS)
    xn = xn * ln_gamma + ln_beta
    return xn @ w + wb


if __name__ == "__main__":
    key = jax.random.PRNGKey(0)
    B, N, D = 2, 64, 32          # batch=2, seq=64, dim=32

    k_x, k_w, k_b = jax.random.split(key, 3)
    x = jax.random.normal(k_x, (B, N, D), dtype=jnp.float32)

    # nn.LayerNorm(dim) default params: weight=1, bias=0.
    ln_gamma = jnp.ones((D,), dtype=jnp.float32)
    ln_beta = jnp.zeros((D,), dtype=jnp.float32)

    # fn = Linear(dim, dim), deterministic init. Stored as (in, out) = W_pt.T.
    w = jax.random.normal(k_w, (D, D), dtype=jnp.float32) * (1.0 / jnp.sqrt(D))
    wb = jax.random.normal(k_b, (D,), dtype=jnp.float32) * 0.02

    y_ref = _reference(x, ln_gamma, ln_beta, w, wb)

    # f32 MXU path (exact vs reference)
    y32 = jax.block_until_ready(
        prenorm_linear(x, ln_gamma, ln_beta, w, wb, use_bf16_matmul=False))
    assert y32.shape == (B, N, D)
    assert jnp.allclose(y32, y_ref, atol=1e-4, rtol=1e-4), "f32 path mismatch"

    # default path (bf16 MXU matmul): looser tolerance
    y = jax.block_until_ready(prenorm_linear(x, ln_gamma, ln_beta, w, wb))
    assert jnp.allclose(y, y_ref, atol=5e-2, rtol=5e-2), "bf16 path mismatch"

    # streamed-W (column-tiled) path, exercised at a D that is a multiple of 128
    D2 = 256
    k_x2, k_w2, k_b2 = jax.random.split(jax.random.PRNGKey(1), 3)
    x2 = jax.random.normal(k_x2, (B, N, D2), dtype=jnp.float32)
    g2 = jnp.ones((D2,), jnp.float32)
    b2 = jnp.zeros((D2,), jnp.float32)
    w2 = jax.random.normal(k_w2, (D2, D2), jnp.float32) * (1.0 / jnp.sqrt(D2))
    wb2 = jax.random.normal(k_b2, (D2,), jnp.float32) * 0.02
    y2_ref = _reference(x2, g2, b2, w2, wb2)
    y2 = jax.block_until_ready(
        prenorm_linear(x2, g2, b2, w2, wb2, use_bf16_matmul=False,
                       force_stream_w=True, col_tile=128))
    assert jnp.allclose(y2, y2_ref, atol=2e-3, rtol=2e-3), "streamed-W mismatch"

    print("KERNEL_OK")
</pallas_src>

<mosaic_0001>
module attributes {stable_mosaic.version = 11 : i64} {
  func.func @_prenorm_linear_kernel(%arg0: i32, %arg1: memref<128x32xf32, #tpu.memory_space<vmem>>, %arg2: memref<1x32xf32, #tpu.memory_space<vmem>>, %arg3: memref<1x32xf32, #tpu.memory_space<vmem>>, %arg4: memref<32x32xf32, #tpu.memory_space<vmem>>, %arg5: memref<1x32xf32, #tpu.memory_space<vmem>>, %arg6: memref<128x32xf32, #tpu.memory_space<vmem>>) attributes {dimension_semantics = [#tpu.dimension_semantics<parallel>], iteration_bounds = array<i64: 1>, scalar_prefetch = 0 : i64, scratch_operands = 0 : i64, tpu.core_type = #tpu.core_type<tc>, window_params = [{transform_indices = @transform_0, window_bounds = array<i64: 128, 32>}, {pipeline_mode = #tpu.pipeline_mode<synchronous>, transform_indices = @transform_1, window_bounds = array<i64: 1, 32>}, {pipeline_mode = #tpu.pipeline_mode<synchronous>, transform_indices = @transform_2, window_bounds = array<i64: 1, 32>}, {pipeline_mode = #tpu.pipeline_mode<synchronous>, transform_indices = @transform_3, window_bounds = array<i64: 32, 32>}, {pipeline_mode = #tpu.pipeline_mode<synchronous>, transform_indices = @transform_4, window_bounds = array<i64: 1, 32>}, {transform_indices = @transform_5, window_bounds = array<i64: 128, 32>}]} {
    %c0 = arith.constant 0 : index
    %c0_0 = arith.constant 0 : index
    %0 = vector.load %arg1[%c0, %c0_0] : memref<128x32xf32, #tpu.memory_space<vmem>>, vector<128x32xf32>
    %cst = arith.constant dense<0.000000e+00> : vector<128xf32>
    %1 = vector.multi_reduction <add>, %0, %cst [1] : vector<128x32xf32> to vector<128xf32>
    %2 = vector.shape_cast %1 : vector<128xf32> to vector<128x1xf32>
    %cst_1 = arith.constant 3.125000e-02 : f32
    %3 = vector.broadcast %cst_1 : f32 to vector<128x1xf32>
    %4 = arith.mulf %2, %3 : vector<128x1xf32>
    %5 = vector.broadcast %4 : vector<128x1xf32> to vector<128x32xf32>
    %6 = arith.subf %0, %5 : vector<128x32xf32>
    %7 = arith.mulf %6, %6 : vector<128x32xf32>
    %cst_2 = arith.constant dense<0.000000e+00> : vector<128xf32>
    %8 = vector.multi_reduction <add>, %7, %cst_2 [1] : vector<128x32xf32> to vector<128xf32>
    %9 = vector.shape_cast %8 : vector<128xf32> to vector<128x1xf32>
    %cst_3 = arith.constant 3.125000e-02 : f32
    %10 = vector.broadcast %cst_3 : f32 to vector<128x1xf32>
    %11 = arith.mulf %9, %10 : vector<128x1xf32>
    %cst_4 = arith.constant 9.99999974E-6 : f32
    %12 = vector.broadcast %cst_4 : f32 to vector<128x1xf32>
    %13 = arith.addf %11, %12 : vector<128x1xf32>
    %14 = math.rsqrt %13 : vector<128x1xf32>
    %15 = vector.broadcast %14 : vector<128x1xf32> to vector<128x32xf32>
    %16 = arith.mulf %6, %15 : vector<128x32xf32>
    %c0_5 = arith.constant 0 : index
    %c0_6 = arith.constant 0 : index
    %17 = vector.load %arg2[%c0_5, %c0_6] : memref<1x32xf32, #tpu.memory_space<vmem>>, vector<1x32xf32>
    %18 = vector.broadcast %17 : vector<1x32xf32> to vector<128x32xf32>
    %19 = arith.mulf %16, %18 : vector<128x32xf32>
    %c0_7 = arith.constant 0 : index
    %c0_8 = arith.constant 0 : index
    %20 = vector.load %arg3[%c0_7, %c0_8] : memref<1x32xf32, #tpu.memory_space<vmem>>, vector<1x32xf32>
    %21 = vector.broadcast %20 : vector<1x32xf32> to vector<128x32xf32>
    %22 = arith.addf %19, %21 : vector<128x32xf32>
    %c0_9 = arith.constant 0 : index
    %c0_10 = arith.constant 0 : index
    %23 = vector.load %arg4[%c0_9, %c0_10] : memref<32x32xf32, #tpu.memory_space<vmem>>, vector<32x32xf32>
    %cst_11 = arith.constant dense<0.000000e+00> : vector<128x32xf32>
    %24 = tpu.matmul %22, %23, %cst_11 {dimension_numbers = #tpu.dot_dimension_numbers<[1], [0], [0], [1], [0, 0, 1, 1], [], []>} : vector<128x32xf32>, vector<32x32xf32>, vector<128x32xf32> -> vector<128x32xf32>
    %c0_12 = arith.constant 0 : index
    %c0_13 = arith.constant 0 : index
    %25 = vector.load %arg5[%c0_12, %c0_13] : memref<1x32xf32, #tpu.memory_space<vmem>>, vector<1x32xf32>
    %26 = vector.broadcast %25 : vector<1x32xf32> to vector<128x32xf32>
    %27 = arith.addf %24, %26 : vector<128x32xf32>
    %c0_14 = arith.constant 0 : index
    %c0_15 = arith.constant 0 : index
    %28 = vector.load %arg6[%c0_14, %c0_15] : memref<128x32xf32, #tpu.memory_space<vmem>>, vector<128x32xf32>
    tpu.vector_store %arg6[%c0_14, %c0_15], %27 {strides = array<i32>} : memref<128x32xf32, #tpu.memory_space<vmem>>, vector<128x32xf32>,
    return
  }
  func.func @transform_0(%arg0: i32) -> (i32, i32) {
    %c0_i32 = arith.constant 0 : i32
    %c0_i32_0 = arith.constant 0 : i32
    return %arg0, %c0_i32 : i32, i32
  }
  func.func @transform_1(%arg0: i32) -> (i32, i32) {
    %c0_i32 = arith.constant 0 : i32
    %c0_i32_0 = arith.constant 0 : i32
    %c0_i32_1 = arith.constant 0 : i32
    return %c0_i32, %c0_i32_0 : i32, i32
  }
  func.func @transform_2(%arg0: i32) -> (i32, i32) {
    %c0_i32 = arith.constant 0 : i32
    %c0_i32_0 = arith.constant 0 : i32
    %c0_i32_1 = arith.constant 0 : i32
    return %c0_i32, %c0_i32_0 : i32, i32
  }
  func.func @transform_3(%arg0: i32) -> (i32, i32) {
    %c0_i32 = arith.constant 0 : i32
    %c0_i32_0 = arith.constant 0 : i32
    %c0_i32_1 = arith.constant 0 : i32
    return %c0_i32, %c0_i32_0 : i32, i32
  }
  func.func @transform_4(%arg0: i32) -> (i32, i32) {
    %c0_i32 = arith.constant 0 : i32
    %c0_i32_0 = arith.constant 0 : i32
    %c0_i32_1 = arith.constant 0 : i32
    return %c0_i32, %c0_i32_0 : i32, i32
  }
  func.func @transform_5(%arg0: i32) -> (i32, i32) {
    %c0_i32 = arith.constant 0 : i32
    %c0_i32_0 = arith.constant 0 : i32
    return %arg0, %c0_i32 : i32, i32
  }
}

module attributes {stable_mosaic.version = 11 : i64} {
  func.func @_prenorm_linear_kernel(%arg0: i32, %arg1: memref<128x32xf32, #tpu.memory_space<vmem>>, %arg2: memref<1x32xf32, #tpu.memory_space<vmem>>, %arg3: memref<1x32xf32, #tpu.memory_space<vmem>>, %arg4: memref<32x32xf32, #tpu.memory_space<vmem>>, %arg5: memref<1x32xf32, #tpu.memory_space<vmem>>, %arg6: memref<128x32xf32, #tpu.memory_space<vmem>>) attributes {dimension_semantics = [#tpu.dimension_semantics<parallel>], iteration_bounds = array<i64: 1>, scalar_prefetch = 0 : i64, scratch_operands = 0 : i64, tpu.core_type = #tpu.core_type<tc>, window_params = [{transform_indices = @transform_0, window_bounds = array<i64: 128, 32>}, {pipeline_mode = #tpu.pipeline_mode<synchronous>, transform_indices = @transform_1, window_bounds = array<i64: 1, 32>}, {pipeline_mode = #tpu.pipeline_mode<synchronous>, transform_indices = @transform_2, window_bounds = array<i64: 1, 32>}, {pipeline_mode = #tpu.pipeline_mode<synchronous>, transform_indices = @transform_3, window_bounds = array<i64: 32, 32>}, {pipeline_mode = #tpu.pipeline_mode<synchronous>, transform_indices = @transform_4, window_bounds = array<i64: 1, 32>}, {transform_indices = @transform_5, window_bounds = array<i64: 128, 32>}]} {
    %c0 = arith.constant 0 : index
    %c0_0 = arith.constant 0 : index
    %0 = vector.load %arg1[%c0, %c0_0] : memref<128x32xf32, #tpu.memory_space<vmem>>, vector<128x32xf32>
    %cst = arith.constant dense<0.000000e+00> : vector<128xf32>
    %1 = vector.multi_reduction <add>, %0, %cst [1] : vector<128x32xf32> to vector<128xf32>
    %2 = vector.shape_cast %1 : vector<128xf32> to vector<128x1xf32>
    %cst_1 = arith.constant 3.125000e-02 : f32
    %3 = vector.broadcast %cst_1 : f32 to vector<128x1xf32>
    %4 = arith.mulf %2, %3 : vector<128x1xf32>
    %5 = vector.broadcast %4 : vector<128x1xf32> to vector<128x32xf32>
    %6 = arith.subf %0, %5 : vector<128x32xf32>
    %7 = arith.mulf %6, %6 : vector<128x32xf32>
    %cst_2 = arith.constant dense<0.000000e+00> : vector<128xf32>
    %8 = vector.multi_reduction <add>, %7, %cst_2 [1] : vector<128x32xf32> to vector<128xf32>
    %9 = vector.shape_cast %8 : vector<128xf32> to vector<128x1xf32>
    %cst_3 = arith.constant 3.125000e-02 : f32
    %10 = vector.broadcast %cst_3 : f32 to vector<128x1xf32>
    %11 = arith.mulf %9, %10 : vector<128x1xf32>
    %cst_4 = arith.constant 9.99999974E-6 : f32
    %12 = vector.broadcast %cst_4 : f32 to vector<128x1xf32>
    %13 = arith.addf %11, %12 : vector<128x1xf32>
    %14 = math.rsqrt %13 : vector<128x1xf32>
    %15 = vector.broadcast %14 : vector<128x1xf32> to vector<128x32xf32>
    %16 = arith.mulf %6, %15 : vector<128x32xf32>
    %c0_5 = arith.constant 0 : index
    %c0_6 = arith.constant 0 : index
    %17 = vector.load %arg2[%c0_5, %c0_6] : memref<1x32xf32, #tpu.memory_space<vmem>>, vector<1x32xf32>
    %18 = vector.broadcast %17 : vector<1x32xf32> to vector<128x32xf32>
    %19 = arith.mulf %16, %18 : vector<128x32xf32>
    %c0_7 = arith.constant 0 : index
    %c0_8 = arith.constant 0 : index
    %20 = vector.load %arg3[%c0_7, %c0_8] : memref<1x32xf32, #tpu.memory_space<vmem>>, vector<1x32xf32>
    %21 = vector.broadcast %20 : vector<1x32xf32> to vector<128x32xf32>
    %22 = arith.addf %19, %21 : vector<128x32xf32>
    %c0_9 = arith.constant 0 : index
    %c0_10 = arith.constant 0 : index
    %23 = vector.load %arg4[%c0_9, %c0_10] : memref<32x32xf32, #tpu.memory_space<vmem>>, vector<32x32xf32>
    %cst_11 = arith.constant dense<0.000000e+00> : vector<128x32xf32>
    %24 = tpu.matmul %22, %23, %cst_11 {dimension_numbers = #tpu.dot_dimension_numbers<[1], [0], [0], [1], [0, 0, 1, 1], [], []>} : vector<128x32xf32>, vector<32x32xf32>, vector<128x32xf32> -> vector<128x32xf32>
    %c0_12 = arith.constant 0 : index
    %c0_13 = arith.constant 0 : index
    %25 = vector.load %arg5[%c0_12, %c0_13] : memref<1x32xf32, #tpu.memory_space<vmem>>, vector<1x32xf32>
    %26 = vector.broadcast %25 : vector<1x32xf32> to vector<128x32xf32>
    %27 = arith.addf %24, %26 : vector<128x32xf32>
    %c0_14 = arith.constant 0 : index
    %c0_15 = arith.constant 0 : index
    %28 = vector.load %arg6[%c0_14, %c0_15] : memref<128x32xf32, #tpu.memory_space<vmem>>, vector<128x32xf32>
    tpu.vector_store %arg6[%c0_14, %c0_15], %27 {strides = array<i32>} : memref<128x32xf32, #tpu.memory_space<vmem>>, vector<128x32xf32>,
    return
  }
  func.func @transform_0(%arg0: i32) -> (i32, i32) {
    %c0_i32 = arith.constant 0 : i32
    %c0_i32_0 = arith.constant 0 : i32
    return %arg0, %c0_i32 : i32, i32
  }
  func.func @transform_1(%arg0: i32) -> (i32, i32) {
    %c0_i32 = arith.constant 0 : i32
    %c0_i32_0 = arith.constant 0 : i32
    %c0_i32_1 = arith.constant 0 : i32
    return %c0_i32, %c0_i32_0 : i32, i32
  }
  func.func @transform_2(%arg0: i32) -> (i32, i32) {
    %c0_i32 = arith.constant 0 : i32
    %c0_i32_0 = arith.constant 0 : i32
    %c0_i32_1 = arith.constant 0 : i32
    return %c0_i32, %c0_i32_0 : i32, i32
  }
  func.func @transform_3(%arg0: i32) -> (i32, i32) {
    %c0_i32 = arith.constant 0 : i32
    %c0_i32_0 = arith.constant 0 : i32
    %c0_i32_1 = arith.constant 0 : i32
    return %c0_i32, %c0_i32_0 : i32, i32
  }
  func.func @transform_4(%arg0: i32) -> (i32, i32) {
    %c0_i32 = arith.constant 0 : i32
    %c0_i32_0 = arith.constant 0 : i32
    %c0_i32_1 = arith.constant 0 : i32
    return %c0_i32, %c0_i32_0 : i32, i32
  }
  func.func @transform_5(%arg0: i32) -> (i32, i32) {
    %c0_i32 = arith.constant 0 : i32
    %c0_i32_0 = arith.constant 0 : i32
    return %arg0, %c0_i32 : i32, i32
  }
}

</mosaic_0001>

<bundles_post_ra>
// kernel: tpu_custom_call.1
= control target key start
LH: loop header
LB: loop body
LE: loop exit
PB: predicated region body
PF: predicated region fallthrough
CT: control target
= control target key end

     0   :  { %vm36_vm0 = vcmask 261120   ;;  %s993_s0 = inlined_call_operand.vmem [shape: f32[128,32], index: 0, kind: input, shape index: {}]   ;;  %s994_s3 = inlined_call_operand.vmem [shape: f32[32,32], index: 3, kind: input, shape index: {}]   ;;  %s995_s1 = inlined_call_operand.vmem [shape: f32[1,32], index: 1, kind: input, shape index: {}]   ;;  %s996_s2 = inlined_call_operand.vmem [shape: f32[1,32], index: 2, kind: input, shape index: {}]   ;;  %s997_s4 = inlined_call_operand.vmem [shape: f32[1,32], index: 4, kind: input, shape index: {}]   ;;  %s998_s5 = inlined_call_operand.vmem [shape: f32[128,32], index: 5, kind: output, shape index: {}]  }
   0x1   :  { %v20_v0 = vld [vmem:[%s993_s0] sm:$0xff]  ;;  %v21_v1 = vld [vmem:[%s993_s0 + $0x8] sm:$0xff]  ;;  %v22_v8 = vld [vmem:[%s993_s0 + $0x10] sm:$0xff] }
   0x2   :  { %v28_v2 = vld [vmem:[%s993_s0 + $0x40] sm:$0xff]  ;;  %v37_v3 = vsel %vm36_vm0, %v20_v0, 0.0  ;;  %v40_v4 = vsel %vm36_vm0, %v21_v1, 0.0  ;;  %v29_v5 = vld [vmem:[%s993_s0 + $0x48] sm:$0xff]  ;;  %v30_v9 = vld [vmem:[%s993_s0 + $0x50] sm:$0xff]  ;;  %v43_v10 = vsel %vm36_vm0, %v22_v8, 0.0 }
   0x3   :  { %38 = vadd.xlane.f32.xlu0 %v37_v3  ;;  %41 = vadd.xlane.f32.xlu1 %v40_v4  ;;  %v61_v6 = vsel %vm36_vm0, %v28_v2, 0.0  ;;  %v64_v7 = vsel %vm36_vm0, %v29_v5, 0.0  ;;  %v67_v11 = vsel %vm36_vm0, %v30_v9, 0.0  ;;  %v683_v12 = vld [vmem:[%s993_s0 + $0x18] sm:$0xff]  ;;  %v697_v16 = vld [vmem:[%s993_s0 + $0x20] sm:$0xff]  ;;  %v711_v20 = vld [vmem:[%s993_s0 + $0x28] sm:$0xff] }
   0x4   :  { %v688_v13 = vld [vmem:[%s993_s0 + $0x58] sm:$0xff]  ;;  %v46_v14 = vsel %vm36_vm0, %v683_v12, 0.0  ;;  %v702_v17 = vld [vmem:[%s993_s0 + $0x60] sm:$0xff]  ;;  %v49_v18 = vsel %vm36_vm0, %v697_v16, 0.0  ;;  %v716_v21 = vld [vmem:[%s993_s0 + $0x68] sm:$0xff]  ;;  %v52_v22 = vsel %vm36_vm0, %v711_v20, 0.0 }
   0x5   :  { %v70_v15 = vsel %vm36_vm0, %v688_v13, 0.0  ;;  %v73_v19 = vsel %vm36_vm0, %v702_v17, 0.0  ;;  %v76_v23 = vsel %vm36_vm0, %v716_v21, 0.0  ;;  %v725_v24 = vld [vmem:[%s993_s0 + $0x30] sm:$0xff]  ;;  %v739_v28 = vld [vmem:[%s993_s0 + $0x38] sm:$0xff] }
   0x6   :  { %v730_v25 = vld [vmem:[%s993_s0 + $0x70] sm:$0xff]  ;;  %v55_v26 = vsel %vm36_vm0, %v725_v24, 0.0  ;;  %v744_v29 = vld [vmem:[%s993_s0 + $0x78] sm:$0xff]  ;;  %v58_v30 = vsel %vm36_vm0, %v739_v28, 0.0 }
   0x7   :  { %62 = vadd.xlane.f32.xlu0 %v61_v6  ;;  %65 = vadd.xlane.f32.xlu1 %v64_v7  ;;  %v79_v27 = vsel %vm36_vm0, %v730_v25, 0.0  ;;  %v82_v31 = vsel %vm36_vm0, %v744_v29, 0.0 }
   0xb   :  { %44 = vadd.xlane.f32.xlu0 %v43_v10  ;;  %68 = vadd.xlane.f32.xlu1 %v67_v11 }
   0xf   :  { %47 = vadd.xlane.f32.xlu0 %v46_v14  ;;  %71 = vadd.xlane.f32.xlu1 %v70_v15 }
  0x13   :  { %50 = vadd.xlane.f32.xlu0 %v49_v18  ;;  %74 = vadd.xlane.f32.xlu1 %v73_v19 }
  0x17   :  { %53 = vadd.xlane.f32.xlu0 %v52_v22  ;;  %77 = vadd.xlane.f32.xlu1 %v76_v23 }
  0x1b   :  { %56 = vadd.xlane.f32.xlu0 %v55_v26  ;;  %80 = vadd.xlane.f32.xlu1 %v79_v27 }
  0x1f   :  { %59 = vadd.xlane.f32.xlu0 %v58_v30  ;;  %83 = vadd.xlane.f32.xlu1 %v82_v31 }
  0x8c   :  { %v39_v32 = vpop.xlane.xlu0 %38  ;;  %v42_v33 = vpop.xlane.xlu1 %41 }
  0x8d   :  { %v85_v34 = vmul.f32 0.03125, %v39_v32  ;;  %v86_v35 = vmul.f32 0.03125, %v42_v33 }
  0x8f   :  { %v750_v36 = vsub.f32 %v20_v0, %v85_v34  ;;  %v752_v37 = vsub.f32 %v21_v1, %v86_v35 }
  0x90   :  { %v63_v38 = vpop.xlane.xlu0 %62  ;;  %v66_v39 = vpop.xlane.xlu1 %65 }
  0x91   :  { %v93_v40 = vmul.f32 0.03125, %v63_v38  ;;  %v94_v41 = vmul.f32 0.03125, %v66_v39  ;;  %v117_v42 = vmul.f32 %v750_v36, %v750_v36  ;;  %v118_v43 = vmul.f32 %v752_v37, %v752_v37 }
  0x93   :  { %v758_v44 = vsub.f32 %v28_v2, %v93_v40  ;;  %v760_v45 = vsub.f32 %v29_v5, %v94_v41  ;;  %v133_v46 = vsel %vm36_vm0, %v117_v42, 0.0  ;;  %v136_v49 = vsel %vm36_vm0, %v118_v43, 0.0 }
  0x94   :  { %134 = vadd.xlane.f32.xlu0 %v133_v46  ;;  %v45_v47 = vpop.xlane.xlu0 %44  ;;  %v69_v48 = vpop.xlane.xlu1 %68 }
  0x95   :  { %v87_v50 = vmul.f32 0.03125, %v45_v47  ;;  %v95_v51 = vmul.f32 0.03125, %v69_v48  ;;  %v125_v52 = vmul.f32 %v758_v44, %v758_v44  ;;  %v126_v53 = vmul.f32 %v760_v45, %v760_v45 }
  0x97   :  { %v768_v54 = vsub.f32 %v22_v8, %v87_v50  ;;  %v770_v55 = vsub.f32 %v30_v9, %v95_v51  ;;  %v157_v56 = vsel %vm36_vm0, %v125_v52, 0.0  ;;  %v160_v59 = vsel %vm36_vm0, %v126_v53, 0.0  ;;  %v293_v53 = vld [vmem:[%s994_s3 + $0x10] sm:$0xff] }
  0x98   :  { %137 = vadd.xlane.f32.xlu0 %v136_v49  ;;  %158 = vadd.xlane.f32.xlu1 %v157_v56  ;;  %v48_v57 = vpop.xlane.xlu0 %47  ;;  %v72_v58 = vpop.xlane.xlu1 %71  ;;  %v292_v56 = vld [vmem:[%s994_s3 + $0x8] sm:$0xff] }
  0x99   :  { %v88_v60 = vmul.f32 0.03125, %v48_v57  ;;  %v96_v61 = vmul.f32 0.03125, %v72_v58  ;;  %v119_v62 = vmul.f32 %v768_v54, %v768_v54  ;;  %v127_v63 = vmul.f32 %v770_v55, %v770_v55  ;;  %v291_v57 = vld [vmem:[%s994_s3] sm:$0xff] }
  0x9b   :  { %v779_v0 = vsub.f32 %v683_v12, %v88_v60  ;;  %v782_v1 = vsub.f32 %v688_v13, %v96_v61  ;;  %v139_v2 = vsel %vm36_vm0, %v119_v62, 0.0  ;;  %v163_v5 = vsel %vm36_vm0, %v127_v63, 0.0 }
  0x9c   :  { %161 = vadd.xlane.f32.xlu1 %v160_v59  ;;  %140 = vadd.xlane.f32.xlu0 %v139_v2  ;;  %v51_v3 = vpop.xlane.xlu0 %50  ;;  %v75_v4 = vpop.xlane.xlu1 %74 }
  0x9d   :  { %v89_v6 = vmul.f32 0.03125, %v51_v3  ;;  %v97_v7 = vmul.f32 0.03125, %v75_v4  ;;  %v120_v8 = vmul.f32 %v779_v0, %v779_v0  ;;  %v128_v9 = vmul.f32 %v782_v1, %v782_v1 }
  0x9f   :  { %v791_v10 = vsub.f32 %v697_v16, %v89_v6  ;;  %v794_v11 = vsub.f32 %v702_v17, %v97_v7  ;;  %v142_v12 = vsel %vm36_vm0, %v120_v8, 0.0  ;;  %v166_v15 = vsel %vm36_vm0, %v128_v9, 0.0 }
  0xa0   :  { %164 = vadd.xlane.f32.xlu1 %v163_v5  ;;  %143 = vadd.xlane.f32.xlu0 %v142_v12  ;;  %v54_v13 = vpop.xlane.xlu0 %53  ;;  %v78_v14 = vpop.xlane.xlu1 %77 }
  0xa1   :  { %v90_v18 = vmul.f32 0.03125, %v54_v13  ;;  %v98_v19 = vmul.f32 0.03125, %v78_v14  ;;  %v121_v22 = vmul.f32 %v791_v10, %v791_v10  ;;  %v129_v16 = vmul.f32 %v794_v11, %v794_v11 }
  0xa3   :  { %v803_v23 = vsub.f32 %v711_v20, %v90_v18  ;;  %v806_v17 = vsub.f32 %v716_v21, %v98_v19  ;;  %v145_v26 = vsel %vm36_vm0, %v121_v22, 0.0  ;;  %v169_v31 = vsel %vm36_vm0, %v129_v16, 0.0 }
  0xa4   :  { %167 = vadd.xlane.f32.xlu1 %v166_v15  ;;  %146 = vadd.xlane.f32.xlu0 %v145_v26  ;;  %v57_v27 = vpop.xlane.xlu0 %56  ;;  %v81_v30 = vpop.xlane.xlu1 %80 }
  0xa5   :  { %v91_v32 = vmul.f32 0.03125, %v57_v27  ;;  %v99_v33 = vmul.f32 0.03125, %v81_v30  ;;  %v122_v34 = vmul.f32 %v803_v23, %v803_v23  ;;  %v130_v20 = vmul.f32 %v806_v17, %v806_v17 }
  0xa7   :  { %v815_v35 = vsub.f32 %v725_v24, %v91_v32  ;;  %v818_v21 = vsub.f32 %v730_v25, %v99_v33  ;;  %v148_v38 = vsel %vm36_vm0, %v122_v34, 0.0  ;;  %v172_v41 = vsel %vm36_vm0, %v130_v20, 0.0  ;;  %v855_v32 = vld [vmem:[%s995_s1] ss:$0 sm:$0xff] }
  0xa8   :  { %170 = vadd.xlane.f32.xlu1 %v169_v31  ;;  %149 = vadd.xlane.f32.xlu0 %v148_v38  ;;  %v60_v39 = vpop.xlane.xlu0 %59  ;;  %v84_v40 = vpop.xlane.xlu1 %83 }
  0xa9   :  { %v92_v42 = vmul.f32 0.03125, %v60_v39  ;;  %v100_v43 = vmul.f32 0.03125, %v84_v40  ;;  %v123_v46 = vmul.f32 %v815_v35, %v815_v35  ;;  %v131_v24 = vmul.f32 %v818_v21, %v818_v21  ;;  %v861_v40 = vld [vmem:[%s996_s2] ss:$0 sm:$0xff] }
  0xab   :  { %v827_v47 = vsub.f32 %v739_v28, %v92_v42  ;;  %v830_v25 = vsub.f32 %v744_v29, %v100_v43  ;;  %v151_v48 = vsel %vm36_vm0, %v123_v46, 0.0  ;;  %v175_v49 = vsel %vm36_vm0, %v131_v24, 0.0  ;;  %v294_v29 = vld [vmem:[%s994_s3 + $0x18] sm:$0xff] }
  0xac   :  { %173 = vadd.xlane.f32.xlu1 %v172_v41  ;;  %152 = vadd.xlane.f32.xlu0 %v151_v48 }
  0xad   :  { %v124_v50 = vmul.f32 %v827_v47, %v827_v47  ;;  %v132_v51 = vmul.f32 %v830_v25, %v830_v25  ;;  %554 = vmatprep.subr.mxu0 %v294_v29  ;;  %586 = vmatprep.subr.mxu1 %v294_v29 }
  0xae   :  { %555 = vmatpush3.msra.mxu0 %v294_v29  ;;  %590 = vmatpush3.msra.mxu1 %v294_v29 }
  0xaf   :  { %v154_v52 = vsel %vm36_vm0, %v124_v50, 0.0  ;;  %v178_v28 = vsel %vm36_vm0, %v132_v51, 0.0  ;;  %556 = vmatprep.subr.mxu0 %v293_v53  ;;  %587 = vmatprep.subr.mxu1 %v293_v53 }
  0xb0   :  { %176 = vadd.xlane.f32.xlu1 %v175_v49  ;;  %155 = vadd.xlane.f32.xlu0 %v154_v52 }
  0xb1   :  { %557 = vmatpush3.msra.mxu0 %v293_v53  ;;  %591 = vmatpush3.msra.mxu1 %v293_v53 }
  0xb2   :  { %558 = vmatprep.subr.mxu0 %v292_v56  ;;  %588 = vmatprep.subr.mxu1 %v292_v56 }
  0xb3   :  { %559 = vmatpush3.msra.mxu0 %v292_v56  ;;  %592 = vmatpush3.msra.mxu1 %v292_v56 }
  0xb4   :  { %179 = vadd.xlane.f32.xlu1 %v178_v28  ;;  %560 = vmatprep.subr.mxu0 %v291_v57 }
  0xb5   :  { %561 = vmatpush3.msra.mxu0 %v291_v57  ;;  %589 = vmatprep.subr.mxu1 %v291_v57 }
  0xb6   :  { %593 = vmatpush3.msra.mxu1 %v291_v57 }
 0x11d   :  { %v135_v58 = vpop.xlane.xlu0 %134 }
 0x11e   :  { %v181_v59 = vmul.f32 0.03125, %v135_v58 }
 0x120   :  { %v197_v60 = vadd.f32 1e-05, %v181_v59 }
 0x121   :  { %v159_v61 = vpop.xlane.xlu1 %158  ;;  %v138_v62 = vpop.xlane.xlu0 %137 }
 0x122   :  { %594 = vrsqrt.f32 %v197_v60  ;;  %v189_v63 = vmul.f32 0.03125, %v159_v61  ;;  %v182_v2 = vmul.f32 0.03125, %v138_v62 }
 0x124   :  { %v205_v3 = vadd.f32 1e-05, %v189_v63  ;;  %v198_v4 = vadd.f32 1e-05, %v182_v2 }
 0x125   :  { %v162_v5 = vpop.xlane.xlu1 %161  ;;  %v141_v6 = vpop.xlane.xlu0 %140 }
 0x126   :  { %596 = vrsqrt.f32 %v205_v3  ;;  %v190_v7 = vmul.f32 0.03125, %v162_v5  ;;  %v183_v8 = vmul.f32 0.03125, %v141_v6 }
 0x127   :  { %598 = vrsqrt.f32 %v198_v4 }
 0x128   :  { %v206_v9 = vadd.f32 1e-05, %v190_v7  ;;  %v199_v12 = vadd.f32 1e-05, %v183_v8 }
 0x129   :  { %v165_v13 = vpop.xlane.xlu1 %164  ;;  %v144_v14 = vpop.xlane.xlu0 %143 }
 0x12a   :  { %600 = vrsqrt.f32 %v206_v9  ;;  %v191_v15 = vmul.f32 0.03125, %v165_v13  ;;  %v184_v18 = vmul.f32 0.03125, %v144_v14 }
 0x12b   :  { %602 = vrsqrt.f32 %v199_v12 }
 0x12c   :  { %v207_v19 = vadd.f32 1e-05, %v191_v15  ;;  %v200_v22 = vadd.f32 1e-05, %v184_v18 }
 0x12d   :  { %v168_v16 = vpop.xlane.xlu1 %167  ;;  %v147_v26 = vpop.xlane.xlu0 %146 }
 0x12e   :  { %604 = vrsqrt.f32 %v207_v19  ;;  %v192_v27 = vmul.f32 0.03125, %v168_v16  ;;  %v185_v30 = vmul.f32 0.03125, %v147_v26 }
 0x12f   :  { %v595_v31 = vpop.eup %594  ;;  %606 = vrsqrt.f32 %v200_v22 }
 0x130   :  { %v208_v33 = vadd.f32 1e-05, %v192_v27  ;;  %v201_v34 = vadd.f32 1e-05, %v185_v30  ;;  %v229_v20 = vmul.f32 %v595_v31, %v750_v36 }
 0x131   :  { %v171_v38 = vpop.xlane.xlu1 %170  ;;  %v150_v39 = vpop.xlane.xlu0 %149 }
 0x132   :  { %608 = vrsqrt.f32 %v208_v33  ;;  %v193_v41 = vmul.f32 0.03125, %v171_v38  ;;  %v186_v42 = vmul.f32 0.03125, %v150_v39  ;;  %v252_v43 = vmul.f32 %v855_v32, %v229_v20 }
 0x133   :  { %v597_v46 = vpop.eup %596  ;;  %610 = vrsqrt.f32 %v201_v34 }
 0x134   :  { %v599_v24 = vpop.eup %598  ;;  %v209_v48 = vadd.f32 1e-05, %v193_v41  ;;  %v202_v49 = vadd.f32 1e-05, %v186_v42  ;;  %v275_v50 = vadd.f32 %v861_v40, %v252_v43  ;;  %v237_v36 = vmul.f32 %v597_v46, %v758_v44 }
 0x135   :  { %v174_v51 = vpop.xlane.xlu1 %173  ;;  %v153_v52 = vpop.xlane.xlu0 %152  ;;  %v230_v28 = vmul.f32 %v599_v24, %v752_v37 }
 0x136   :  { %612 = vrsqrt.f32 %v209_v48  ;;  %v194_v29 = vmul.f32 0.03125, %v174_v51  ;;  %v187_v53 = vmul.f32 0.03125, %v153_v52  ;;  %562 = vmatprep.mubr.msk.f32.mxu0 %vm36_vm0, %v275_v50  ;;  %v260_v56 = vmul.f32 %v855_v32, %v237_v36 }
 0x137   :  { %v601_v57 = vpop.eup %600  ;;  %614 = vrsqrt.f32 %v202_v49  ;;  %v253_v58 = vmul.f32 %v855_v32, %v230_v28 }
 0x138   :  { %v603_v59 = vpop.eup %602  ;;  %v210_v60 = vadd.f32 1e-05, %v194_v29  ;;  %v203_v61 = vadd.f32 1e-05, %v187_v53  ;;  %v283_v44 = vadd.f32 %v861_v40, %v260_v56  ;;  %v238_v62 = vmul.f32 %v601_v57, %v760_v45 }
 0x139   :  { %v177_v63 = vpop.xlane.xlu1 %176  ;;  %v156_v37 = vpop.xlane.xlu0 %155  ;;  %v276_v2 = vadd.f32 %v861_v40, %v253_v58  ;;  %v231_v3 = vmul.f32 %v603_v59, %v768_v54 }
 0x13a   :  { %616 = vrsqrt.f32 %v210_v60  ;;  %v195_v4 = vmul.f32 0.03125, %v177_v63  ;;  %v188_v5 = vmul.f32 0.03125, %v156_v37  ;;  %574 = vmatprep.mubr.msk.f32.mxu1 %vm36_vm0, %v283_v44  ;;  %v261_v6 = vmul.f32 %v855_v32, %v238_v62  ;;  %v517_v44 = vld [vmem:[%s997_s4] ss:$0 sm:$0xff] }
 0x13b   :  { %v605_v7 = vpop.eup %604  ;;  %618 = vrsqrt.f32 %v203_v61  ;;  %563 = vmatmul.mubr.msk.f32.vlgmr.msra.gmra.mxu0 %vm36_vm0, %v276_v2  ;;  %v254_v8 = vmul.f32 %v855_v32, %v231_v3 }
 0x13c   :  { %v607_v45 = vpop.eup %606  ;;  %v211_v9 = vadd.f32 1e-05, %v195_v4  ;;  %v204_v12 = vadd.f32 1e-05, %v188_v5  ;;  %v284_v13 = vadd.f32 %v861_v40, %v261_v6  ;;  %v239_v54 = vmul.f32 %v605_v7, %v770_v55 }
 0x13d   :  { %v180_v14 = vpop.xlane.xlu1 %179  ;;  %v277_v15 = vadd.f32 %v861_v40, %v254_v8  ;;  %v232_v18 = vmul.f32 %v607_v45, %v779_v0 }
 0x13e   :  { %620 = vrsqrt.f32 %v211_v9  ;;  %v196_v19 = vmul.f32 0.03125, %v180_v14  ;;  %575 = vmatmul.mubr.msk.f32.vlgmr.msra.gmra.mxu1 %vm36_vm0, %v284_v13  ;;  %v262_v22 = vmul.f32 %v855_v32, %v239_v54 }
 0x13f   :  { %v609_v16 = vpop.eup %608  ;;  %622 = vrsqrt.f32 %v204_v12  ;;  %565 = vmatprep.mubr.msk.f32.mxu0 %vm36_vm0, %v277_v15  ;;  %v255_v26 = vmul.f32 %v855_v32, %v232_v18 }
 0x140   :  { %v611_v27 = vpop.eup %610  ;;  %v212_v30 = vadd.f32 1e-05, %v196_v19  ;;  %v285_v55 = vadd.f32 %v861_v40, %v262_v22  ;;  %v240_v31 = vmul.f32 %v609_v16, %v782_v1 }
 0x141   :  { %v278_v0 = vadd.f32 %v861_v40, %v255_v26  ;;  %v233_v33 = vmul.f32 %v611_v27, %v791_v10 }
 0x142   :  { %624 = vrsqrt.f32 %v212_v30  ;;  %577 = vmatprep.mubr.msk.f32.mxu1 %vm36_vm0, %v285_v55  ;;  %v263_v34 = vmul.f32 %v855_v32, %v240_v31 }
 0x143   :  { %v613_v20 = vpop.eup %612  ;;  %566 = vmatmul.mubr.msk.f32.gmra.mxu0 %vm36_vm0, %v278_v0  ;;  %v256_v38 = vmul.f32 %v855_v32, %v233_v33 }
 0x144   :  { %v615_v39 = vpop.eup %614  ;;  %v286_v41 = vadd.f32 %v861_v40, %v263_v34  ;;  %v241_v42 = vmul.f32 %v613_v20, %v794_v11 }
 0x145   :  { %v279_v1 = vadd.f32 %v861_v40, %v256_v38  ;;  %v234_v43 = vmul.f32 %v615_v39, %v803_v23 }
 0x146   :  { %578 = vmatmul.mubr.msk.f32.gmra.mxu1 %vm36_vm0, %v286_v41  ;;  %v264_v10 = vmul.f32 %v855_v32, %v241_v42 }
 0x147   :  { %v617_v46 = vpop.eup %616  ;;  %568 = vmatprep.mubr.msk.f32.mxu0 %vm36_vm0, %v279_v1  ;;  %v257_v24 = vmul.f32 %v855_v32, %v234_v43 }
 0x148   :  { %v619_v48 = vpop.eup %618  ;;  %v287_v49 = vadd.f32 %v861_v40, %v264_v10  ;;  %v242_v50 = vmul.f32 %v617_v46, %v806_v17 }
 0x149   :  { %v280_v11 = vadd.f32 %v861_v40, %v257_v24  ;;  %v235_v36 = vmul.f32 %v619_v48, %v815_v35 }
 0x14a   :  { %580 = vmatprep.mubr.msk.f32.mxu1 %vm36_vm0, %v287_v49  ;;  %v265_v23 = vmul.f32 %v855_v32, %v242_v50 }
 0x14b   :  { %v621_v51 = vpop.eup %620  ;;  %569 = vmatmul.mubr.msk.f32.gmra.mxu0 %vm36_vm0, %v280_v11  ;;  %v258_v52 = vmul.f32 %v855_v32, %v235_v36 }
 0x14c   :  { %v623_v28 = vpop.eup %622  ;;  %v288_v29 = vadd.f32 %v861_v40, %v265_v23  ;;  %v243_v53 = vmul.f32 %v621_v51, %v818_v21 }
 0x14d   :  { %v281_v17 = vadd.f32 %v861_v40, %v258_v52  ;;  %v236_v56 = vmul.f32 %v623_v28, %v827_v47 }
 0x14e   :  { %581 = vmatmul.mubr.msk.f32.gmra.mxu1 %vm36_vm0, %v288_v29  ;;  %v266_v35 = vmul.f32 %v855_v32, %v243_v53 }
 0x14f   :  { %v625_v57 = vpop.eup %624  ;;  %571 = vmatprep.mubr.msk.f32.mxu0 %vm36_vm0, %v281_v17  ;;  %v259_v58 = vmul.f32 %v855_v32, %v236_v56 }
 0x150   :  { %v289_v59 = vadd.f32 %v861_v40, %v266_v35  ;;  %v244_v60 = vmul.f32 %v625_v57, %v830_v25 }
 0x151   :  { %v282_v61 = vadd.f32 %v861_v40, %v259_v58 }
 0x152   :  { %583 = vmatprep.mubr.msk.f32.mxu1 %vm36_vm0, %v289_v59  ;;  %v267_v21 = vmul.f32 %v855_v32, %v244_v60 }
 0x153   :  { %572 = vmatmul.mubr.msk.f32.gmra.mxu0 %vm36_vm0, %v282_v61 }
 0x154   :  { %v290_v47 = vadd.f32 %v861_v40, %v267_v21 }
 0x156   :  { %584 = vmatmul.mubr.msk.f32.gmra.mxu1 %vm36_vm0, %v290_v47 }
 0x1fb   :  { %v564_v62 = vpop.f32.mrf.mxu0 }
 0x1fc   :  { %v422_v63 = vadd.f32 %v564_v62, %v517_v44 }
 0x1fd   :  { %v416_v37 = vpop.f32.mrf.mxu0 }
 0x1fe   :  { %496 = vst.msk [vmem:[%s998_s5 + $0x8] sm:$0xff] %vm36_vm0, %v422_v63  ;;  %v417_v25 = vadd.f32 %v517_v44, %v416_v37  ;;  %v576_v32 = vpop.f32.mrf.mxu1 }
 0x1ff   :  { %v462_v2 = vadd.f32 %v576_v32, %v517_v44 }
 0x200   :  { %495 = vst.msk [vmem:[%s998_s5] sm:$0xff] %vm36_vm0, %v417_v25  ;;  %v456_v40 = vpop.f32.mrf.mxu1 }
 0x201   :  { %504 = vst.msk [vmem:[%s998_s5 + $0x48] sm:$0xff] %vm36_vm0, %v462_v2  ;;  %v457_v3 = vadd.f32 %v517_v44, %v456_v40 }
 0x203   :  { %503 = vst.msk [vmem:[%s998_s5 + $0x40] sm:$0xff] %vm36_vm0, %v457_v3  ;;  %v567_v4 = vpop.f32.mrf.mxu0 }
 0x204   :  { %v432_v5 = vadd.f32 %v567_v4, %v517_v44 }
 0x205   :  { %v426_v6 = vpop.f32.mrf.mxu0 }
 0x206   :  { %498 = vst.msk [vmem:[%s998_s5 + $0x18] sm:$0xff] %vm36_vm0, %v432_v5  ;;  %v427_v7 = vadd.f32 %v517_v44, %v426_v6  ;;  %v579_v8 = vpop.f32.mrf.mxu1 }
 0x207   :  { %v472_v45 = vadd.f32 %v579_v8, %v517_v44 }
 0x208   :  { %497 = vst.msk [vmem:[%s998_s5 + $0x10] sm:$0xff] %vm36_vm0, %v427_v7  ;;  %v466_v9 = vpop.f32.mrf.mxu1 }
 0x209   :  { %506 = vst.msk [vmem:[%s998_s5 + $0x58] sm:$0xff] %vm36_vm0, %v472_v45  ;;  %v467_v12 = vadd.f32 %v517_v44, %v466_v9 }
 0x20b   :  { %505 = vst.msk [vmem:[%s998_s5 + $0x50] sm:$0xff] %vm36_vm0, %v467_v12  ;;  %v570_v13 = vpop.f32.mrf.mxu0 }
 0x20c   :  { %v442_v54 = vadd.f32 %v570_v13, %v517_v44 }
 0x20d   :  { %v436_v14 = vpop.f32.mrf.mxu0 }
 0x20e   :  { %500 = vst.msk [vmem:[%s998_s5 + $0x28] sm:$0xff] %vm36_vm0, %v442_v54  ;;  %v437_v15 = vadd.f32 %v517_v44, %v436_v14  ;;  %v582_v18 = vpop.f32.mrf.mxu1 }
 0x20f   :  { %v482_v19 = vadd.f32 %v582_v18, %v517_v44 }
 0x210   :  { %499 = vst.msk [vmem:[%s998_s5 + $0x20] sm:$0xff] %vm36_vm0, %v437_v15  ;;  %v476_v22 = vpop.f32.mrf.mxu1 }
 0x211   :  { %508 = vst.msk [vmem:[%s998_s5 + $0x68] sm:$0xff] %vm36_vm0, %v482_v19  ;;  %v477_v16 = vadd.f32 %v517_v44, %v476_v22 }
 0x213   :  { %507 = vst.msk [vmem:[%s998_s5 + $0x60] sm:$0xff] %vm36_vm0, %v477_v16  ;;  %v573_v26 = vpop.f32.mrf.mxu0 }
 0x214   :  { %v452_v27 = vadd.f32 %v573_v26, %v517_v44 }
 0x215   :  { %v446_v30 = vpop.f32.mrf.mxu0 }
 0x216   :  { %502 = vst.msk [vmem:[%s998_s5 + $0x38] sm:$0xff] %vm36_vm0, %v452_v27  ;;  %v447_v55 = vadd.f32 %v517_v44, %v446_v30  ;;  %v585_v31 = vpop.f32.mrf.mxu1 }
 0x217   :  { %v492_v0 = vadd.f32 %v585_v31, %v517_v44 }
 0x218   :  { %501 = vst.msk [vmem:[%s998_s5 + $0x30] sm:$0xff] %vm36_vm0, %v447_v55  ;;  %v486_v33 = vpop.f32.mrf.mxu1 }
 0x219   :  { %510 = vst.msk [vmem:[%s998_s5 + $0x78] sm:$0xff] %vm36_vm0, %v492_v0  ;;  %v487_v34 = vadd.f32 %v517_v44, %v486_v33 }
 0x21b   :  { %509 = vst.msk [vmem:[%s998_s5 + $0x70] sm:$0xff] %vm36_vm0, %v487_v34 }

// kernel: tpu_custom_call.1
= control target key start
LH: loop header
LB: loop body
LE: loop exit
PB: predicated region body
PF: predicated region fallthrough
CT: control target
= control target key end

     0   :  { %vm36_vm0 = vcmask 261120   ;;  %s993_s0 = inlined_call_operand.vmem [shape: f32[128,32], index: 0, kind: input, shape index: {}]   ;;  %s994_s3 = inlined_call_operand.vmem [shape: f32[32,32], index: 3, kind: input, shape index: {}]   ;;  %s995_s1 = inlined_call_operand.vmem [shape: f32[1,32], index: 1, kind: input, shape index: {}]   ;;  %s996_s2 = inlined_call_operand.vmem [shape: f32[1,32], index: 2, kind: input, shape index: {}]   ;;  %s997_s4 = inlined_call_operand.vmem [shape: f32[1,32], index: 4, kind: input, shape index: {}]   ;;  %s998_s5 = inlined_call_operand.vmem [shape: f32[128,32], index: 5, kind: output, shape index: {}]  }
   0x1   :  { %v20_v0 = vld [vmem:[%s993_s0] sm:$0xff]  ;;  %v21_v1 = vld [vmem:[%s993_s0 + $0x8] sm:$0xff]  ;;  %v22_v8 = vld [vmem:[%s993_s0 + $0x10] sm:$0xff] }
   0x2   :  { %v28_v2 = vld [vmem:[%s993_s0 + $0x40] sm:$0xff]  ;;  %v37_v3 = vsel %vm36_vm0, %v20_v0, 0.0  ;;  %v40_v4 = vsel %vm36_vm0, %v21_v1, 0.0  ;;  %v29_v5 = vld [vmem:[%s993_s0 + $0x48] sm:$0xff]  ;;  %v30_v9 = vld [vmem:[%s993_s0 + $0x50] sm:$0xff]  ;;  %v43_v10 = vsel %vm36_vm0, %v22_v8, 0.0 }
   0x3   :  { %38 = vadd.xlane.f32.xlu0 %v37_v3  ;;  %41 = vadd.xlane.f32.xlu1 %v40_v4  ;;  %v61_v6 = vsel %vm36_vm0, %v28_v2, 0.0  ;;  %v64_v7 = vsel %vm36_vm0, %v29_v5, 0.0  ;;  %v67_v11 = vsel %vm36_vm0, %v30_v9, 0.0  ;;  %v683_v12 = vld [vmem:[%s993_s0 + $0x18] sm:$0xff]  ;;  %v697_v16 = vld [vmem:[%s993_s0 + $0x20] sm:$0xff]  ;;  %v711_v20 = vld [vmem:[%s993_s0 + $0x28] sm:$0xff] }
   0x4   :  { %v688_v13 = vld [vmem:[%s993_s0 + $0x58] sm:$0xff]  ;;  %v46_v14 = vsel %vm36_vm0, %v683_v12, 0.0  ;;  %v702_v17 = vld [vmem:[%s993_s0 + $0x60] sm:$0xff]  ;;  %v49_v18 = vsel %vm36_vm0, %v697_v16, 0.0  ;;  %v716_v21 = vld [vmem:[%s993_s0 + $0x68] sm:$0xff]  ;;  %v52_v22 = vsel %vm36_vm0, %v711_v20, 0.0 }
   0x5   :  { %v70_v15 = vsel %vm36_vm0, %v688_v13, 0.0  ;;  %v73_v19 = vsel %vm36_vm0, %v702_v17, 0.0  ;;  %v76_v23 = vsel %vm36_vm0, %v716_v21, 0.0  ;;  %v725_v24 = vld [vmem:[%s993_s0 + $0x30] sm:$0xff]  ;;  %v739_v28 = vld [vmem:[%s993_s0 + $0x38] sm:$0xff] }
   0x6   :  { %v730_v25 = vld [vmem:[%s993_s0 + $0x70] sm:$0xff]  ;;  %v55_v26 = vsel %vm36_vm0, %v725_v24, 0.0  ;;  %v744_v29 = vld [vmem:[%s993_s0 + $0x78] sm:$0xff]  ;;  %v58_v30 = vsel %vm36_vm0, %v739_v28, 0.0 }
   0x7   :  { %62 = vadd.xlane.f32.xlu0 %v61_v6  ;;  %65 = vadd.xlane.f32.xlu1 %v64_v7  ;;  %v79_v27 = vsel %vm36_vm0, %v730_v25, 0.0  ;;  %v82_v31 = vsel %vm36_vm0, %v744_v29, 0.0 }
   0xb   :  { %44 = vadd.xlane.f32.xlu0 %v43_v10  ;;  %68 = vadd.xlane.f32.xlu1 %v67_v11 }
   0xf   :  { %47 = vadd.xlane.f32.xlu0 %v46_v14  ;;  %71 = vadd.xlane.f32.xlu1 %v70_v15 }
  0x13   :  { %50 = vadd.xlane.f32.xlu0 %v49_v18  ;;  %74 = vadd.xlane.f32.xlu1 %v73_v19 }
  0x17   :  { %53 = vadd.xlane.f32.xlu0 %v52_v22  ;;  %77 = vadd.xlane.f32.xlu1 %v76_v23 }
  0x1b   :  { %56 = vadd.xlane.f32.xlu0 %v55_v26  ;;  %80 = vadd.xlane.f32.xlu1 %v79_v27 }
  0x1f   :  { %59 = vadd.xlane.f32.xlu0 %v58_v30  ;;  %83 = vadd.xlane.f32.xlu1 %v82_v31 }
  0x8c   :  { %v39_v32 = vpop.xlane.xlu0 %38  ;;  %v42_v33 = vpop.xlane.xlu1 %41 }
  0x8d   :  { %v85_v34 = vmul.f32 0.03125, %v39_v32  ;;  %v86_v35 = vmul.f32 0.03125, %v42_v33 }
  0x8f   :  { %v750_v36 = vsub.f32 %v20_v0, %v85_v34  ;;  %v752_v37 = vsub.f32 %v21_v1, %v86_v35 }
  0x90   :  { %v63_v38 = vpop.xlane.xlu0 %62  ;;  %v66_v39 = vpop.xlane.xlu1 %65 }
  0x91   :  { %v93_v40 = vmul.f32 0.03125, %v63_v38  ;;  %v94_v41 = vmul.f32 0.03125, %v66_v39  ;;  %v117_v42 = vmul.f32 %v750_v36, %v750_v36  ;;  %v118_v43 = vmul.f32 %v752_v37, %v752_v37 }
  0x93   :  { %v758_v44 = vsub.f32 %v28_v2, %v93_v40  ;;  %v760_v45 = vsub.f32 %v29_v5, %v94_v41  ;;  %v133_v46 = vsel %vm36_vm0, %v117_v42, 0.0  ;;  %v136_v49 = vsel %vm36_vm0, %v118_v43, 0.0 }
  0x94   :  { %134 = vadd.xlane.f32.xlu0 %v133_v46  ;;  %v45_v47 = vpop.xlane.xlu0 %44  ;;  %v69_v48 = vpop.xlane.xlu1 %68 }
  0x95   :  { %v87_v50 = vmul.f32 0.03125, %v45_v47  ;;  %v95_v51 = vmul.f32 0.03125, %v69_v48  ;;  %v125_v52 = vmul.f32 %v758_v44, %v758_v44  ;;  %v126_v53 = vmul.f32 %v760_v45, %v760_v45 }
  0x97   :  { %v768_v54 = vsub.f32 %v22_v8, %v87_v50  ;;  %v770_v55 = vsub.f32 %v30_v9, %v95_v51  ;;  %v157_v56 = vsel %vm36_vm0, %v125_v52, 0.0  ;;  %v160_v59 = vsel %vm36_vm0, %v126_v53, 0.0  ;;  %v293_v53 = vld [vmem:[%s994_s3 + $0x10] sm:$0xff] }
  0x98   :  { %137 = vadd.xlane.f32.xlu0 %v136_v49  ;;  %158 = vadd.xlane.f32.xlu1 %v157_v56  ;;  %v48_v57 = vpop.xlane.xlu0 %47  ;;  %v72_v58 = vpop.xlane.xlu1 %71  ;;  %v292_v56 = vld [vmem:[%s994_s3 + $0x8] sm:$0xff] }
  0x99   :  { %v88_v60 = vmul.f32 0.03125, %v48_v57  ;;  %v96_v61 = vmul.f32 0.03125, %v72_v58  ;;  %v119_v62 = vmul.f32 %v768_v54, %v768_v54  ;;  %v127_v63 = vmul.f32 %v770_v55, %v770_v55  ;;  %v291_v57 = vld [vmem:[%s994_s3] sm:$0xff] }
  0x9b   :  { %v779_v0 = vsub.f32 %v683_v12, %v88_v60  ;;  %v782_v1 = vsub.f32 %v688_v13, %v96_v61  ;;  %v139_v2 = vsel %vm36_vm0, %v119_v62, 0.0  ;;  %v163_v5 = vsel %vm36_vm0, %v127_v63, 0.0 }
  0x9c   :  { %161 = vadd.xlane.f32.xlu1 %v160_v59  ;;  %140 = vadd.xlane.f32.xlu0 %v139_v2  ;;  %v51_v3 = vpop.xlane.xlu0 %50  ;;  %v75_v4 = vpop.xlane.xlu1 %74 }
  0x9d   :  { %v89_v6 = vmul.f32 0.03125, %v51_v3  ;;  %v97_v7 = vmul.f32 0.03125, %v75_v4  ;;  %v120_v8 = vmul.f32 %v779_v0, %v779_v0  ;;  %v128_v9 = vmul.f32 %v782_v1, %v782_v1 }
  0x9f   :  { %v791_v10 = vsub.f32 %v697_v16, %v89_v6  ;;  %v794_v11 = vsub.f32 %v702_v17, %v97_v7  ;;  %v142_v12 = vsel %vm36_vm0, %v120_v8, 0.0  ;;  %v166_v15 = vsel %vm36_vm0, %v128_v9, 0.0 }
  0xa0   :  { %164 = vadd.xlane.f32.xlu1 %v163_v5  ;;  %143 = vadd.xlane.f32.xlu0 %v142_v12  ;;  %v54_v13 = vpop.xlane.xlu0 %53  ;;  %v78_v14 = vpop.xlane.xlu1 %77 }
  0xa1   :  { %v90_v18 = vmul.f32 0.03125, %v54_v13  ;;  %v98_v19 = vmul.f32 0.03125, %v78_v14  ;;  %v121_v22 = vmul.f32 %v791_v10, %v791_v10  ;;  %v129_v16 = vmul.f32 %v794_v11, %v794_v11 }
  0xa3   :  { %v803_v23 = vsub.f32 %v711_v20, %v90_v18  ;;  %v806_v17 = vsub.f32 %v716_v21, %v98_v19  ;;  %v145_v26 = vsel %vm36_vm0, %v121_v22, 0.0  ;;  %v169_v31 = vsel %vm36_vm0, %v129_v16, 0.0 }
  0xa4   :  { %167 = vadd.xlane.f32.xlu1 %v166_v15  ;;  %146 = vadd.xlane.f32.xlu0 %v145_v26  ;;  %v57_v27 = vpop.xlane.xlu0 %56  ;;  %v81_v30 = vpop.xlane.xlu1 %80 }
  0xa5   :  { %v91_v32 = vmul.f32 0.03125, %v57_v27  ;;  %v99_v33 = vmul.f32 0.03125, %v81_v30  ;;  %v122_v34 = vmul.f32 %v803_v23, %v803_v23  ;;  %v130_v20 = vmul.f32 %v806_v17, %v806_v17 }
  0xa7   :  { %v815_v35 = vsub.f32 %v725_v24, %v91_v32  ;;  %v818_v21 = vsub.f32 %v730_v25, %v99_v33  ;;  %v148_v38 = vsel %vm36_vm0, %v122_v34, 0.0  ;;  %v172_v41 = vsel %vm36_vm0, %v130_v20, 0.0  ;;  %v855_v32 = vld [vmem:[%s995_s1] ss:$0 sm:$0xff] }
  0xa8   :  { %170 = vadd.xlane.f32.xlu1 %v169_v31  ;;  %149 = vadd.xlane.f32.xlu0 %v148_v38  ;;  %v60_v39 = vpop.xlane.xlu0 %59  ;;  %v84_v40 = vpop.xlane.xlu1 %83 }
  0xa9   :  { %v92_v42 = vmul.f32 0.03125, %v60_v39  ;;  %v100_v43 = vmul.f32 0.03125, %v84_v40  ;;  %v123_v46 = vmul.f32 %v815_v35, %v815_v35  ;;  %v131_v24 = vmul.f32 %v818_v21, %v818_v21  ;;  %v861_v40 = vld [vmem:[%s996_s2] ss:$0 sm:$0xff] }
  0xab   :  { %v827_v47 = vsub.f32 %v739_v28, %v92_v42  ;;  %v830_v25 = vsub.f32 %v744_v29, %v100_v43  ;;  %v151_v48 = vsel %vm36_vm0, %v123_v46, 0.0  ;;  %v175_v49 = vsel %vm36_vm0, %v131_v24, 0.0  ;;  %v294_v29 = vld [vmem:[%s994_s3 + $0x18] sm:$0xff] }
  0xac   :  { %173 = vadd.xlane.f32.xlu1 %v172_v41  ;;  %152 = vadd.xlane.f32.xlu0 %v151_v48 }
  0xad   :  { %v124_v50 = vmul.f32 %v827_v47, %v827_v47  ;;  %v132_v51 = vmul.f32 %v830_v25, %v830_v25  ;;  %554 = vmatprep.subr.mxu0 %v294_v29  ;;  %586 = vmatprep.subr.mxu1 %v294_v29 }
  0xae   :  { %555 = vmatpush3.msra.mxu0 %v294_v29  ;;  %590 = vmatpush3.msra.mxu1 %v294_v29 }
  0xaf   :  { %v154_v52 = vsel %vm36_vm0, %v124_v50, 0.0  ;;  %v178_v28 = vsel %vm36_vm0, %v132_v51, 0.0  ;;  %556 = vmatprep.subr.mxu0 %v293_v53  ;;  %587 = vmatprep.subr.mxu1 %v293_v53 }
  0xb0   :  { %176 = vadd.xlane.f32.xlu1 %v175_v49  ;;  %155 = vadd.xlane.f32.xlu0 %v154_v52 }
  0xb1   :  { %557 = vmatpush3.msra.mxu0 %v293_v53  ;;  %591 = vmatpush3.msra.mxu1 %v293_v53 }
  0xb2   :  { %558 = vmatprep.subr.mxu0 %v292_v56  ;;  %588 = vmatprep.subr.mxu1 %v292_v56 }
  0xb3   :  { %559 = vmatpush3.msra.mxu0 %v292_v56  ;;  %592 = vmatpush3.msra.mxu1 %v292_v56 }
  0xb4   :  { %179 = vadd.xlane.f32.xlu1 %v178_v28  ;;  %560 = vmatprep.subr.mxu0 %v291_v57 }
  0xb5   :  { %561 = vmatpush3.msra.mxu0 %v291_v57  ;;  %589 = vmatprep.subr.mxu1 %v291_v57 }
  0xb6   :  { %593 = vmatpush3.msra.mxu1 %v291_v57 }
 0x11d   :  { %v135_v58 = vpop.xlane.xlu0 %134 }
 0x11e   :  { %v181_v59 = vmul.f32 0.03125, %v135_v58 }
 0x120   :  { %v197_v60 = vadd.f32 1e-05, %v181_v59 }
 0x121   :  { %v159_v61 = vpop.xlane.xlu1 %158  ;;  %v138_v62 = vpop.xlane.xlu0 %137 }
 0x122   :  { %594 = vrsqrt.f32 %v197_v60  ;;  %v189_v63 = vmul.f32 0.03125, %v159_v61  ;;  %v182_v2 = vmul.f32 0.03125, %v138_v62 }
 0x124   :  { %v205_v3 = vadd.f32 1e-05, %v189_v63  ;;  %v198_v4 = vadd.f32 1e-05, %v182_v2 }
 0x125   :  { %v162_v5 = vpop.xlane.xlu1 %161  ;;  %v141_v6 = vpop.xlane.xlu0 %140 }
 0x126   :  { %596 = vrsqrt.f32 %v205_v3  ;;  %v190_v7 = vmul.f32 0.03125, %v162_v5  ;;  %v183_v8 = vmul.f32 0.03125, %v141_v6 }
 0x127   :  { %598 = vrsqrt.f32 %v198_v4 }
 0x128   :  { %v206_v9 = vadd.f32 1e-05, %v190_v7  ;;  %v199_v12 = vadd.f32 1e-05, %v183_v8 }
 0x129   :  { %v165_v13 = vpop.xlane.xlu1 %164  ;;  %v144_v14 = vpop.xlane.xlu0 %143 }
 0x12a   :  { %600 = vrsqrt.f32 %v206_v9  ;;  %v191_v15 = vmul.f32 0.03125, %v165_v13  ;;  %v184_v18 = vmul.f32 0.03125, %v144_v14 }
 0x12b   :  { %602 = vrsqrt.f32 %v199_v12 }
 0x12c   :  { %v207_v19 = vadd.f32 1e-05, %v191_v15  ;;  %v200_v22 = vadd.f32 1e-05, %v184_v18 }
 0x12d   :  { %v168_v16 = vpop.xlane.xlu1 %167  ;;  %v147_v26 = vpop.xlane.xlu0 %146 }
 0x12e   :  { %604 = vrsqrt.f32 %v207_v19  ;;  %v192_v27 = vmul.f32 0.03125, %v168_v16  ;;  %v185_v30 = vmul.f32 0.03125, %v147_v26 }
 0x12f   :  { %v595_v31 = vpop.eup %594  ;;  %606 = vrsqrt.f32 %v200_v22 }
 0x130   :  { %v208_v33 = vadd.f32 1e-05, %v192_v27  ;;  %v201_v34 = vadd.f32 1e-05, %v185_v30  ;;  %v229_v20 = vmul.f32 %v595_v31, %v750_v36 }
 0x131   :  { %v171_v38 = vpop.xlane.xlu1 %170  ;;  %v150_v39 = vpop.xlane.xlu0 %149 }
 0x132   :  { %608 = vrsqrt.f32 %v208_v33  ;;  %v193_v41 = vmul.f32 0.03125, %v171_v38  ;;  %v186_v42 = vmul.f32 0.03125, %v150_v39  ;;  %v252_v43 = vmul.f32 %v855_v32, %v229_v20 }
 0x133   :  { %v597_v46 = vpop.eup %596  ;;  %610 = vrsqrt.f32 %v201_v34 }
 0x134   :  { %v599_v24 = vpop.eup %598  ;;  %v209_v48 = vadd.f32 1e-05, %v193_v41  ;;  %v202_v49 = vadd.f32 1e-05, %v186_v42  ;;  %v275_v50 = vadd.f32 %v861_v40, %v252_v43  ;;  %v237_v36 = vmul.f32 %v597_v46, %v758_v44 }
 0x135   :  { %v174_v51 = vpop.xlane.xlu1 %173  ;;  %v153_v52 = vpop.xlane.xlu0 %152  ;;  %v230_v28 = vmul.f32 %v599_v24, %v752_v37 }
 0x136   :  { %612 = vrsqrt.f32 %v209_v48  ;;  %v194_v29 = vmul.f32 0.03125, %v174_v51  ;;  %v187_v53 = vmul.f32 0.03125, %v153_v52  ;;  %562 = vmatprep.mubr.msk.f32.mxu0 %vm36_vm0, %v275_v50  ;;  %v260_v56 = vmul.f32 %v855_v32, %v237_v36 }
 0x137   :  { %v601_v57 = vpop.eup %600  ;;  %614 = vrsqrt.f32 %v202_v49  ;;  %v253_v58 = vmul.f32 %v855_v32, %v230_v28 }
 0x138   :  { %v603_v59 = vpop.eup %602  ;;  %v210_v60 = vadd.f32 1e-05, %v194_v29  ;;  %v203_v61 = vadd.f32 1e-05, %v187_v53  ;;  %v283_v44 = vadd.f32 %v861_v40, %v260_v56  ;;  %v238_v62 = vmul.f32 %v601_v57, %v760_v45 }
 0x139   :  { %v177_v63 = vpop.xlane.xlu1 %176  ;;  %v156_v37 = vpop.xlane.xlu0 %155  ;;  %v276_v2 = vadd.f32 %v861_v40, %v253_v58  ;;  %v231_v3 = vmul.f32 %v603_v59, %v768_v54 }
 0x13a   :  { %616 = vrsqrt.f32 %v210_v60  ;;  %v195_v4 = vmul.f32 0.03125, %v177_v63  ;;  %v188_v5 = vmul.f32 0.03125, %v156_v37  ;;  %574 = vmatprep.mubr.msk.f32.mxu1 %vm36_vm0, %v283_v44  ;;  %v261_v6 = vmul.f32 %v855_v32, %v238_v62  ;;  %v517_v44 = vld [vmem:[%s997_s4] ss:$0 sm:$0xff] }
 0x13b   :  { %v605_v7 = vpop.eup %604  ;;  %618 = vrsqrt.f32 %v203_v61  ;;  %563 = vmatmul.mubr.msk.f32.vlgmr.msra.gmra.mxu0 %vm36_vm0, %v276_v2  ;;  %v254_v8 = vmul.f32 %v855_v32, %v231_v3 }
 0x13c   :  { %v607_v45 = vpop.eup %606  ;;  %v211_v9 = vadd.f32 1e-05, %v195_v4  ;;  %v204_v12 = vadd.f32 1e-05, %v188_v5  ;;  %v284_v13 = vadd.f32 %v861_v40, %v261_v6  ;;  %v239_v54 = vmul.f32 %v605_v7, %v770_v55 }
 0x13d   :  { %v180_v14 = vpop.xlane.xlu1 %179  ;;  %v277_v15 = vadd.f32 %v861_v40, %v254_v8  ;;  %v232_v18 = vmul.f32 %v607_v45, %v779_v0 }
 0x13e   :  { %620 = vrsqrt.f32 %v211_v9  ;;  %v196_v19 = vmul.f32 0.03125, %v180_v14  ;;  %575 = vmatmul.mubr.msk.f32.vlgmr.msra.gmra.mxu1 %vm36_vm0, %v284_v13  ;;  %v262_v22 = vmul.f32 %v855_v32, %v239_v54 }
 0x13f   :  { %v609_v16 = vpop.eup %608  ;;  %622 = vrsqrt.f32 %v204_v12  ;;  %565 = vmatprep.mubr.msk.f32.mxu0 %vm36_vm0, %v277_v15  ;;  %v255_v26 = vmul.f32 %v855_v32, %v232_v18 }
 0x140   :  { %v611_v27 = vpop.eup %610  ;;  %v212_v30 = vadd.f32 1e-05, %v196_v19  ;;  %v285_v55 = vadd.f32 %v861_v40, %v262_v22  ;;  %v240_v31 = vmul.f32 %v609_v16, %v782_v1 }
 0x141   :  { %v278_v0 = vadd.f32 %v861_v40, %v255_v26  ;;  %v233_v33 = vmul.f32 %v611_v27, %v791_v10 }
 0x142   :  { %624 = vrsqrt.f32 %v212_v30  ;;  %577 = vmatprep.mubr.msk.f32.mxu1 %vm36_vm0, %v285_v55  ;;  %v263_v34 = vmul.f32 %v855_v32, %v240_v31 }
 0x143   :  { %v613_v20 = vpop.eup %612  ;;  %566 = vmatmul.mubr.msk.f32.gmra.mxu0 %vm36_vm0, %v278_v0  ;;  %v256_v38 = vmul.f32 %v855_v32, %v233_v33 }
 0x144   :  { %v615_v39 = vpop.eup %614  ;;  %v286_v41 = vadd.f32 %v861_v40, %v263_v34  ;;  %v241_v42 = vmul.f32 %v613_v20, %v794_v11 }
 0x145   :  { %v279_v1 = vadd.f32 %v861_v40, %v256_v38  ;;  %v234_v43 = vmul.f32 %v615_v39, %v803_v23 }
 0x146   :  { %578 = vmatmul.mubr.msk.f32.gmra.mxu1 %vm36_vm0, %v286_v41  ;;  %v264_v10 = vmul.f32 %v855_v32, %v241_v42 }
 0x147   :  { %v617_v46 = vpop.eup %616  ;;  %568 = vmatprep.mubr.msk.f32.mxu0 %vm36_vm0, %v279_v1  ;;  %v257_v24 = vmul.f32 %v855_v32, %v234_v43 }
 0x148   :  { %v619_v48 = vpop.eup %618  ;;  %v287_v49 = vadd.f32 %v861_v40, %v264_v10  ;;  %v242_v50 = vmul.f32 %v617_v46, %v806_v17 }
 0x149   :  { %v280_v11 = vadd.f32 %v861_v40, %v257_v24  ;;  %v235_v36 = vmul.f32 %v619_v48, %v815_v35 }
 0x14a   :  { %580 = vmatprep.mubr.msk.f32.mxu1 %vm36_vm0, %v287_v49  ;;  %v265_v23 = vmul.f32 %v855_v32, %v242_v50 }
 0x14b   :  { %v621_v51 = vpop.eup %620  ;;  %569 = vmatmul.mubr.msk.f32.gmra.mxu0 %vm36_vm0, %v280_v11  ;;  %v258_v52 = vmul.f32 %v855_v32, %v235_v36 }
 0x14c   :  { %v623_v28 = vpop.eup %622  ;;  %v288_v29 = vadd.f32 %v861_v40, %v265_v23  ;;  %v243_v53 = vmul.f32 %v621_v51, %v818_v21 }
 0x14d   :  { %v281_v17 = vadd.f32 %v861_v40, %v258_v52  ;;  %v236_v56 = vmul.f32 %v623_v28, %v827_v47 }
 0x14e   :  { %581 = vmatmul.mubr.msk.f32.gmra.mxu1 %vm36_vm0, %v288_v29  ;;  %v266_v35 = vmul.f32 %v855_v32, %v243_v53 }
 0x14f   :  { %v625_v57 = vpop.eup %624  ;;  %571 = vmatprep.mubr.msk.f32.mxu0 %vm36_vm0, %v281_v17  ;;  %v259_v58 = vmul.f32 %v855_v32, %v236_v56 }
 0x150   :  { %v289_v59 = vadd.f32 %v861_v40, %v266_v35  ;;  %v244_v60 = vmul.f32 %v625_v57, %v830_v25 }
 0x151   :  { %v282_v61 = vadd.f32 %v861_v40, %v259_v58 }
 0x152   :  { %583 = vmatprep.mubr.msk.f32.mxu1 %vm36_vm0, %v289_v59  ;;  %v267_v21 = vmul.f32 %v855_v32, %v244_v60 }
 0x153   :  { %572 = vmatmul.mubr.msk.f32.gmra.mxu0 %vm36_vm0, %v282_v61 }
 0x154   :  { %v290_v47 = vadd.f32 %v861_v40, %v267_v21 }
 0x156   :  { %584 = vmatmul.mubr.msk.f32.gmra.mxu1 %vm36_vm0, %v290_v47 }
 0x1fb   :  { %v564_v62 = vpop.f32.mrf.mxu0 }
 0x1fc   :  { %v422_v63 = vadd.f32 %v564_v62, %v517_v44 }
 0x1fd   :  { %v416_v37 = vpop.f32.mrf.mxu0 }
 0x1fe   :  { %496 = vst.msk [vmem:[%s998_s5 + $0x8] sm:$0xff] %vm36_vm0, %v422_v63  ;;  %v417_v25 = vadd.f32 %v517_v44, %v416_v37  ;;  %v576_v32 = vpop.f32.mrf.mxu1 }
 0x1ff   :  { %v462_v2 = vadd.f32 %v576_v32, %v517_v44 }
 0x200   :  { %495 = vst.msk [vmem:[%s998_s5] sm:$0xff] %vm36_vm0, %v417_v25  ;;  %v456_v40 = vpop.f32.mrf.mxu1 }
 0x201   :  { %504 = vst.msk [vmem:[%s998_s5 + $0x48] sm:$0xff] %vm36_vm0, %v462_v2  ;;  %v457_v3 = vadd.f32 %v517_v44, %v456_v40 }
 0x203   :  { %503 = vst.msk [vmem:[%s998_s5 + $0x40] sm:$0xff] %vm36_vm0, %v457_v3  ;;  %v567_v4 = vpop.f32.mrf.mxu0 }
 0x204   :  { %v432_v5 = vadd.f32 %v567_v4, %v517_v44 }
 0x205   :  { %v426_v6 = vpop.f32.mrf.mxu0 }
 0x206   :  { %498 = vst.msk [vmem:[%s998_s5 + $0x18] sm:$0xff] %vm36_vm0, %v432_v5  ;;  %v427_v7 = vadd.f32 %v517_v44, %v426_v6  ;;  %v579_v8 = vpop.f32.mrf.mxu1 }
 0x207   :  { %v472_v45 = vadd.f32 %v579_v8, %v517_v44 }
 0x208   :  { %497 = vst.msk [vmem:[%s998_s5 + $0x10] sm:$0xff] %vm36_vm0, %v427_v7  ;;  %v466_v9 = vpop.f32.mrf.mxu1 }
 0x209   :  { %506 = vst.msk [vmem:[%s998_s5 + $0x58] sm:$0xff] %vm36_vm0, %v472_v45  ;;  %v467_v12 = vadd.f32 %v517_v44, %v466_v9 }
 0x20b   :  { %505 = vst.msk [vmem:[%s998_s5 + $0x50] sm:$0xff] %vm36_vm0, %v467_v12  ;;  %v570_v13 = vpop.f32.mrf.mxu0 }
 0x20c   :  { %v442_v54 = vadd.f32 %v570_v13, %v517_v44 }
 0x20d   :  { %v436_v14 = vpop.f32.mrf.mxu0 }
 0x20e   :  { %500 = vst.msk [vmem:[%s998_s5 + $0x28] sm:$0xff] %vm36_vm0, %v442_v54  ;;  %v437_v15 = vadd.f32 %v517_v44, %v436_v14  ;;  %v582_v18 = vpop.f32.mrf.mxu1 }
 0x20f   :  { %v482_v19 = vadd.f32 %v582_v18, %v517_v44 }
 0x210   :  { %499 = vst.msk [vmem:[%s998_s5 + $0x20] sm:$0xff] %vm36_vm0, %v437_v15  ;;  %v476_v22 = vpop.f32.mrf.mxu1 }
 0x211   :  { %508 = vst.msk [vmem:[%s998_s5 + $0x68] sm:$0xff] %vm36_vm0, %v482_v19  ;;  %v477_v16 = vadd.f32 %v517_v44, %v476_v22 }
 0x213   :  { %507 = vst.msk [vmem:[%s998_s5 + $0x60] sm:$0xff] %vm36_vm0, %v477_v16  ;;  %v573_v26 = vpop.f32.mrf.mxu0 }
 0x214   :  { %v452_v27 = vadd.f32 %v573_v26, %v517_v44 }
 0x215   :  { %v446_v30 = vpop.f32.mrf.mxu0 }
 0x216   :  { %502 = vst.msk [vmem:[%s998_s5 + $0x38] sm:$0xff] %vm36_vm0, %v452_v27  ;;  %v447_v55 = vadd.f32 %v517_v44, %v446_v30  ;;  %v585_v31 = vpop.f32.mrf.mxu1 }
 0x217   :  { %v492_v0 = vadd.f32 %v585_v31, %v517_v44 }
 0x218   :  { %501 = vst.msk [vmem:[%s998_s5 + $0x30] sm:$0xff] %vm36_vm0, %v447_v55  ;;  %v486_v33 = vpop.f32.mrf.mxu1 }
 0x219   :  { %510 = vst.msk [vmem:[%s998_s5 + $0x78] sm:$0xff] %vm36_vm0, %v492_v0  ;;  %v487_v34 = vadd.f32 %v517_v44, %v486_v33 }
 0x21b   :  { %509 = vst.msk [vmem:[%s998_s5 + $0x70] sm:$0xff] %vm36_vm0, %v487_v34 }

</bundles_post_ra>
